<compile_context>
chip_gen: v7x
topology: tpu7x:2x2x1
jax: 0.10.0
libtpu: 0.0.40
codegen_flags: <defaults>
</compile_context>

<pallas_src>
import jax
import jax.numpy as jnp
from jax.experimental import pallas as pl
from jax.experimental.pallas import tpu as pltpu

_LANE = 128
_ROW_ALIGN = 32        # batch-tile multiple: covers f32 (8), bf16 (16), int8 (32) sublane packing


def _round_up(n, m):
    return (n + m - 1) // m * m


def _vmem_budget():
    # Generation-aware headroom: ~48 MiB on v7x (64 MiB/TC), ~96 MiB on v5e/v6e (128 MiB).
    try:
        cap = int(pltpu.get_tpu_info().vmem_capacity_bytes)
    except Exception:
        cap = 64 * 1024 * 1024
    return cap * 3 // 4


def _mlp_kernel(x_ref, w1_ref, w2_ref, w3_ref, b_ref, o_ref):
    # x_ref : (TB, F) activation tile in its native dtype (streamed per grid step)
    # w*_ref: VMEM-resident weights (constant index_maps -> DMA'd once)
    # b_ref : (3, max(H1,H2,OUT)) packed biases: row0->b1, row1->b2, row2->b3
    h1_w = w1_ref.shape[1]
    h2_w = w2_ref.shape[1]
    out_w = w3_ref.shape[1]

    # In-kernel .float(): free VPU work under a memory-bound regime and avoids
    # a wrapper-side f32 copy in HBM when the observations are not already f32.
    x = x_ref[...].astype(jnp.float32)

    h1 = jnp.dot(x, w1_ref[...], preferred_element_type=jnp.float32) + b_ref[0:1, :h1_w]
    h1 = jnp.maximum(h1, 0.0)                      # ReLU

    h2 = jnp.dot(h1, w2_ref[...], preferred_element_type=jnp.float32) + b_ref[1:2, :h2_w]
    h2 = jnp.maximum(h2, 0.0)                      # ReLU

    # Store only the real output columns; HBM destination stays contiguous.
    o_ref[...] = (jnp.dot(h2, w3_ref[...], preferred_element_type=jnp.float32)
                  + b_ref[2:3, :out_w])


def init_params(key, input_size, output_size, layers_sizes=(32, 32)):
    """PyTorch nn.Linear-style init: U(-1/sqrt(fan_in), +1/sqrt(fan_in)).
    Weights stored (in, out) so the kernel computes y = x @ W + b
    (equivalent to PyTorch's x @ W_t.T + b)."""
    sizes = [input_size] + list(layers_sizes) + [output_size]
    params = []
    for i in range(len(sizes) - 1):
        fan_in, fan_out = sizes[i], sizes[i + 1]
        key, kw, kb = jax.random.split(key, 3)
        bound = 1.0 / (fan_in ** 0.5)
        w = jax.random.uniform(kw, (fan_in, fan_out), jnp.float32, -bound, bound)
        b = jax.random.uniform(kb, (fan_out,), jnp.float32, -bound, bound)
        params.extend([w, b])
    return tuple(params)


def pack_params(params):
    """Pack raw (w1,b1,w2,b2,w3,b3) into kernel form: biases packed into one
    small (3, max_width) buffer, weights un-padded (no lane-padded output)."""
    w1, b1, w2, b2, w3, b3 = params
    h1, h2, out = w1.shape[1], w2.shape[1], w3.shape[1]
    bw = max(h1, h2, out)
    b_packed = jnp.zeros((3, bw), jnp.float32)
    b_packed = b_packed.at[0, :h1].set(b1.reshape(-1).astype(jnp.float32))
    b_packed = b_packed.at[1, :h2].set(b2.reshape(-1).astype(jnp.float32))
    b_packed = b_packed.at[2, :out].set(b3.reshape(-1).astype(jnp.float32))
    return (w1.astype(jnp.float32), w2.astype(jnp.float32),
            w3.astype(jnp.float32), b_packed)


def dqn_forward(x, packed_params, output_size, *, block_b=16384):
    """x: (B, ...) -> flattened to (B, F). Returns (B, output_size) float32."""
    w1, w2, w3, b_packed = packed_params
    B = x.shape[0]
    x2d = x.reshape(B, -1)                         # nn.Flatten; cast happens in-kernel
    F = x2d.shape[1]
    h1, h2 = w1.shape[1], w2.shape[1]
    out = w3.shape[1]
    assert out == output_size

    weight_bytes = 4 * (w1.size + w2.size + w3.size + b_packed.size)

    # Lane-padded VMEM accounting: a (tb, F) tile occupies tb * round_up(F,128)
    # elements in VMEM regardless of F (native (8,128) tiling), double-buffered.
    in_item = jnp.dtype(x2d.dtype).itemsize
    per_row_bytes = 2 * (in_item * _round_up(F, _LANE)      # streamed input
                         + 4 * _round_up(out, _LANE))       # streamed output
    budget = _vmem_budget()
    avail = max(budget - 2 * weight_bytes - (2 << 20), per_row_bytes * _ROW_ALIGN)

    tb = min(block_b, avail // per_row_bytes)
    # >= 2 grid steps once B is large enough so v7x's 2 TensorCores both get work.
    tb = min(tb, _round_up(pl.cdiv(B, 2), _ROW_ALIGN))
    tb = max(_ROW_ALIGN, (tb // _ROW_ALIGN) * _ROW_ALIGN)
    tb = int(tb)

    # Ragged last block: rows >= B of the final tile are undefined on load and
    # their outputs are clipped on writeback -- never observed by the caller.
    grid = (pl.cdiv(B, tb),)
    resident = lambda i: (0, 0)                    # weights/biases: DMA once, stay in VMEM

    flops = 2 * B * (F * h1 + h1 * h2 + h2 * out)
    bytes_accessed = in_item * B * F + 4 * B * out + weight_bytes

    out_arr = pl.pallas_call(
        _mlp_kernel,
        out_shape=jax.ShapeDtypeStruct((B, out), jnp.float32),
        grid=grid,
        in_specs=[
            pl.BlockSpec((tb, F), lambda i: (i, 0)),        # streamed activations
            pl.BlockSpec(w1.shape, resident),
            pl.BlockSpec(w2.shape, resident),
            pl.BlockSpec(w3.shape, resident),
            pl.BlockSpec(b_packed.shape, resident),
        ],
        out_specs=pl.BlockSpec((tb, out), lambda i: (i, 0)),  # real columns only
        compiler_params=pltpu.CompilerParams(
            dimension_semantics=("parallel",),   # shard batch tiles over TCs
            vmem_limit_bytes=int(budget)),
        cost_estimate=pl.CostEstimate(flops=flops, transcendentals=0,
                                      bytes_accessed=bytes_accessed),
    )(x2d, w1, w2, w3, b_packed)

    return out_arr


def _reference_forward(x, params):
    B = x.shape[0]
    h = x.reshape(B, -1).astype(jnp.float32)
    w1, b1, w2, b2, w3, b3 = params
    h = jnp.maximum(h @ w1 + b1, 0.0)
    h = jnp.maximum(h @ w2 + b2, 0.0)
    return h @ w3 + b3


if __name__ == "__main__":
    key = jax.random.PRNGKey(0)
    k_in, k_par = jax.random.split(key)

    # Small shapes consistent with the module: a (2, 4, 2, 2) input that
    # nn.Flatten turns into 16 features; 4 actions; hidden layers [32, 32].
    B, C, H, W = 2, 4, 2, 2
    input_size = C * H * W            # 16
    output_size = 4
    x = jax.random.normal(k_in, (B, C, H, W), dtype=jnp.float32)

    raw_params = init_params(k_par, input_size, output_size, layers_sizes=(32, 32))
    packed_params = pack_params(raw_params)

    out = dqn_forward(x, packed_params, output_size)
    out = jax.block_until_ready(out)

    ref = _reference_forward(x, raw_params)
    assert out.shape == (B, output_size)
    assert jnp.allclose(out, ref, atol=1e-5, rtol=1e-5)

    print("KERNEL_OK")
</pallas_src>

<mosaic_0001>
module attributes {stable_mosaic.version = 11 : i64} {
  func.func @_mlp_kernel(%arg0: i32, %arg1: memref<32x16xf32, #tpu.memory_space<vmem>>, %arg2: memref<16x32xf32, #tpu.memory_space<vmem>>, %arg3: memref<32x32xf32, #tpu.memory_space<vmem>>, %arg4: memref<32x4xf32, #tpu.memory_space<vmem>>, %arg5: memref<3x32xf32, #tpu.memory_space<vmem>>, %arg6: memref<32x4xf32, #tpu.memory_space<vmem>>) attributes {dimension_semantics = [#tpu.dimension_semantics<parallel>], iteration_bounds = array<i64: 1>, scalar_prefetch = 0 : i64, scratch_operands = 0 : i64, tpu.core_type = #tpu.core_type<tc>, window_params = [{transform_indices = @transform_0, window_bounds = array<i64: 32, 16>}, {pipeline_mode = #tpu.pipeline_mode<synchronous>, transform_indices = @transform_1, window_bounds = array<i64: 16, 32>}, {pipeline_mode = #tpu.pipeline_mode<synchronous>, transform_indices = @transform_2, window_bounds = array<i64: 32, 32>}, {pipeline_mode = #tpu.pipeline_mode<synchronous>, transform_indices = @transform_3, window_bounds = array<i64: 32, 4>}, {pipeline_mode = #tpu.pipeline_mode<synchronous>, transform_indices = @transform_4, window_bounds = array<i64: 3, 32>}, {transform_indices = @transform_5, window_bounds = array<i64: 32, 4>}]} {
    %c0 = arith.constant 0 : index
    %c0_0 = arith.constant 0 : index
    %0 = vector.load %arg1[%c0, %c0_0] : memref<32x16xf32, #tpu.memory_space<vmem>>, vector<32x16xf32>
    %c0_1 = arith.constant 0 : index
    %c0_2 = arith.constant 0 : index
    %1 = vector.load %arg2[%c0_1, %c0_2] : memref<16x32xf32, #tpu.memory_space<vmem>>, vector<16x32xf32>
    %cst = arith.constant dense<0.000000e+00> : vector<32x32xf32>
    %2 = tpu.matmul %0, %1, %cst {dimension_numbers = #tpu.dot_dimension_numbers<[1], [0], [0], [1], [0, 0, 1, 1], [], []>} : vector<32x16xf32>, vector<16x32xf32>, vector<32x32xf32> -> vector<32x32xf32>
    %c0_3 = arith.constant 0 : index
    %c0_4 = arith.constant 0 : index
    %3 = vector.load %arg5[%c0_3, %c0_4] : memref<3x32xf32, #tpu.memory_space<vmem>>, vector<1x32xf32>
    %4 = vector.broadcast %3 : vector<1x32xf32> to vector<32x32xf32>
    %5 = arith.addf %2, %4 : vector<32x32xf32>
    %cst_5 = arith.constant 0.000000e+00 : f32
    %6 = vector.broadcast %cst_5 : f32 to vector<32x32xf32>
    %7 = arith.maximumf %5, %6 : vector<32x32xf32>
    %c0_6 = arith.constant 0 : index
    %c0_7 = arith.constant 0 : index
    %8 = vector.load %arg3[%c0_6, %c0_7] : memref<32x32xf32, #tpu.memory_space<vmem>>, vector<32x32xf32>
    %cst_8 = arith.constant dense<0.000000e+00> : vector<32x32xf32>
    %9 = tpu.matmul %7, %8, %cst_8 {dimension_numbers = #tpu.dot_dimension_numbers<[1], [0], [0], [1], [0, 0, 1, 1], [], []>} : vector<32x32xf32>, vector<32x32xf32>, vector<32x32xf32> -> vector<32x32xf32>
    %c1 = arith.constant 1 : index
    %c0_9 = arith.constant 0 : index
    %10 = vector.load %arg5[%c1, %c0_9] : memref<3x32xf32, #tpu.memory_space<vmem>>, vector<1x32xf32>
    %11 = vector.broadcast %10 : vector<1x32xf32> to vector<32x32xf32>
    %12 = arith.addf %9, %11 : vector<32x32xf32>
    %cst_10 = arith.constant 0.000000e+00 : f32
    %13 = vector.broadcast %cst_10 : f32 to vector<32x32xf32>
    %14 = arith.maximumf %12, %13 : vector<32x32xf32>
    %c0_11 = arith.constant 0 : index
    %c0_12 = arith.constant 0 : index
    %15 = vector.load %arg4[%c0_11, %c0_12] : memref<32x4xf32, #tpu.memory_space<vmem>>, vector<32x4xf32>
    %cst_13 = arith.constant dense<0.000000e+00> : vector<32x4xf32>
    %16 = tpu.matmul %14, %15, %cst_13 {dimension_numbers = #tpu.dot_dimension_numbers<[1], [0], [0], [1], [0, 0, 1, 1], [], []>} : vector<32x32xf32>, vector<32x4xf32>, vector<32x4xf32> -> vector<32x4xf32>
    %c2 = arith.constant 2 : index
    %c0_14 = arith.constant 0 : index
    %17 = vector.load %arg5[%c2, %c0_14] : memref<3x32xf32, #tpu.memory_space<vmem>>, vector<1x4xf32>
    %18 = vector.broadcast %17 : vector<1x4xf32> to vector<32x4xf32>
    %19 = arith.addf %16, %18 : vector<32x4xf32>
    %c0_15 = arith.constant 0 : index
    %c0_16 = arith.constant 0 : index
    %20 = vector.load %arg6[%c0_15, %c0_16] : memref<32x4xf32, #tpu.memory_space<vmem>>, vector<32x4xf32>
    tpu.vector_store %arg6[%c0_15, %c0_16], %19 {strides = array<i32>} : memref<32x4xf32, #tpu.memory_space<vmem>>, vector<32x4xf32>,
    return
  }
  func.func @transform_0(%arg0: i32) -> (i32, i32) {
    %c0_i32 = arith.constant 0 : i32
    %c0_i32_0 = arith.constant 0 : i32
    return %arg0, %c0_i32 : i32, i32
  }
  func.func @transform_1(%arg0: i32) -> (i32, i32) {
    %c0_i32 = arith.constant 0 : i32
    %c0_i32_0 = arith.constant 0 : i32
    %c0_i32_1 = arith.constant 0 : i32
    return %c0_i32, %c0_i32_0 : i32, i32
  }
  func.func @transform_2(%arg0: i32) -> (i32, i32) {
    %c0_i32 = arith.constant 0 : i32
    %c0_i32_0 = arith.constant 0 : i32
    %c0_i32_1 = arith.constant 0 : i32
    return %c0_i32, %c0_i32_0 : i32, i32
  }
  func.func @transform_3(%arg0: i32) -> (i32, i32) {
    %c0_i32 = arith.constant 0 : i32
    %c0_i32_0 = arith.constant 0 : i32
    %c0_i32_1 = arith.constant 0 : i32
    return %c0_i32, %c0_i32_0 : i32, i32
  }
  func.func @transform_4(%arg0: i32) -> (i32, i32) {
    %c0_i32 = arith.constant 0 : i32
    %c0_i32_0 = arith.constant 0 : i32
    %c0_i32_1 = arith.constant 0 : i32
    return %c0_i32, %c0_i32_0 : i32, i32
  }
  func.func @transform_5(%arg0: i32) -> (i32, i32) {
    %c0_i32 = arith.constant 0 : i32
    %c0_i32_0 = arith.constant 0 : i32
    return %arg0, %c0_i32 : i32, i32
  }
}

</mosaic_0001>

<bundles_post_ra>
// kernel: tpu_custom_call.1
= control target key start
LH: loop header
LB: loop body
LE: loop exit
PB: predicated region body
PF: predicated region fallthrough
CT: control target
= control target key end

     0   :  { %10 = vsyncpa [#allocation3], 0  ;;  %s653_s0 = inlined_call_operand.vmem [shape: f32[2,16], index: 0, kind: input, shape index: {}]   ;;  %s654_s1 = inlined_call_operand.hbm [shape: f32[16,32], index: 1, kind: input, shape index: {}]   ;;  %s655_s2 = inlined_call_operand.vmem [shape: f32[32,32], index: 2, kind: input, shape index: {}]   ;;  %s656_s3 = inlined_call_operand.vmem [shape: f32[32,4], index: 3, kind: input, shape index: {}]   ;;  %s657_s4 = inlined_call_operand.vmem [shape: f32[3,32], index: 4, kind: input, shape index: {}]   ;;  %s658_s5 = inlined_call_operand.hbm [shape: f32[2,4], index: 5, kind: output, shape index: {}]  }
   0x1   :  { %11 = vsyncpa [#allocation4], 0  ;;  %s536_s18 = smov [#allocation2]   ;;  %s488_s22 = scalar_lea.hbm %s654_s1, 256 }
   0x2   :  { %s19_s19 = sshll.u32 %s536_s18, 4  ;;  %p489_p0 = scmp.ne.s32.totalorder %s654_s1, %s488_s22  ;;  %s20_s19 = int_to_ptr.vmem [resolvable:$true] %s19_s19 }
   0x3   :  { %p492_p1 = scmp.lt.u32.totalorder %s488_s22, %s654_s1 }
   0x5   :  { %p494_p2 = pnand %p492_p1, %p489_p0 }
   0x7   :  { %497 = shalt.err (!%p494_p2)
}
   0x8   :  { %s498_s27 = scalar_lea.vmem %s20_s19, 256  ;;  %p503_p4 = scmp.lt.s32.totalorder %s20_s19, %s20_s19 }
   0x9   :  { %p499_p3 = scmp.ne.s32.totalorder %s20_s19, %s498_s27  ;;  %p504_p5 = scmp.lt.s32.totalorder %s498_s27, %s498_s27 }
   0xb   :  { %p505_p6 = por %p504_p5, %p503_p4 }
   0xd   :  { %p506_p7 = pnand %p505_p6, %p499_p3 }
   0xf   :  { %509 = shalt.err (!%p506_p7)
}
  0x10   :  { %s537_s28 = smov 128   ;;  %s538_s29 = smov 8  }
  0x11   :  { %25 = dma.hbm_to_vmem [thread:$0]  %s654_s1, 256, %s20_s19, [#allocation3], %s537_s28, %s537_s28, %s538_s29  }
  0x12   :  { %532 = dma.done.wait [#allocation3], 256  }
  0x13   :  { %533 = vsyncadd [#allocation3], 4294967040  ;;  %vm46_vm0 = vcmask 130048   ;;  %v39_v0 = vld [vmem:[#allocation2] sm:$0xff]  ;;  %v40_v1 = vld [vmem:[#allocation2 + $0x8] sm:$0xff]  ;;  %vm157_vm1 = vcmask 261120  }
  0x14   :  { %v35_v2 = vld [vmem:[%s653_s0] sm:$0xff]  ;;  %v462_v3 = vpack.c.bf16 %v40_v1, %v39_v0  ;;  %v149_v5 = vld [vmem:[%s655_s2 + $0x8] sm:$0xff]  ;;  %v37_v8 = vld [vmem:[%s653_s0 + $0x10] sm:$0xff]  ;;  %vm365_vm2 = vcmask 31744  }
  0x15   :  { %428 = vmatprep.mubr.msk.f32.mxu0 %vm46_vm0, %v35_v2  ;;  %v148_v4 = vld [vmem:[%s655_s2] sm:$0xff]  ;;  %v36_v7 = vld [vmem:[%s653_s0 + $0x8] sm:$0xff]  ;;  %v38_v9 = vld [vmem:[%s653_s0 + $0x18] sm:$0xff] }
  0x16   :  { %463 = vmatprep.subr.bf16.mxu0 %v462_v3  ;;  %v466_v6 = vpack.c.bf16 %v149_v5, %v148_v4  ;;  %v150_v10 = vld [vmem:[%s655_s2 + $0x10] sm:$0xff]  ;;  %v151_v11 = vld [vmem:[%s655_s2 + $0x18] sm:$0xff]  ;;  %v259_v13 = vld [vmem:[%s656_s3] sm:$0xff] }
  0x17   :  { %465 = vmatpush3.bf16.msra.mxu0 %v462_v3  ;;  %v470_v12 = vpack.c.bf16 %v151_v11, %v150_v10  ;;  %v260_v14 = vld [vmem:[%s656_s3 + $0x8] sm:$0xff]  ;;  %v387_v16 = vld [vmem:[%s657_s4] ss:$0 sm:$0xff]  ;;  %v261_v29 = vld [vmem:[%s656_s3 + $0x10] sm:$0xff] }
  0x18   :  { %467 = vmatprep.subr.bf16.mxu1 %v466_v6  ;;  %v474_v15 = vpack.c.bf16 %v260_v14, %v259_v13  ;;  %v262_v30 = vld [vmem:[%s656_s3 + $0x18] sm:$0xff]  ;;  %v392_v32 = vld [vmem:[%s657_s4 + $0x1] ss:$0 sm:$0xff]  ;;  %v397_v45 = vld [vmem:[%s657_s4 + $0x2] ss:$0 sm:$0xff] }
  0x19   :  { %469 = vmatpush3.bf16.msra.mxu1 %v466_v6  ;;  %v478_v31 = vpack.c.bf16 %v262_v30, %v261_v29 }
  0x1a   :  { %429 = vmatmul.mubr.msk.f32.vlgmr.msra.gmra.mrb[0].mxu0 %vm46_vm0, %v36_v7  ;;  %471 = vmatprep.subr.bf16.mxu1 %v470_v12 }
  0x1b   :  { %431 = vmatprep.mubr.msk.f32.mxu0 %vm46_vm0, %v37_v8  ;;  %475 = vmatprep.subr.bf16.mxu0 %v474_v15 }
  0x1c   :  { %477 = vmatpush3.bf16.msra.mxu0 %v474_v15 }
  0x1d   :  { %473 = vmatpush3.bf16.msra.mxu1 %v470_v12  ;;  %479 = vmatprep.subr.bf16.mxu0 %v478_v31 }
  0x1e   :  { %432 = vmatmul.mubr.msk.f32.gmra.mrb[2].mxu0 %vm46_vm0, %v38_v9 }
  0x20   :  { %481 = vmatpush3.bf16.msra.mxu0 %v478_v31 }
  0xed   :  { %v430_v17 = vpop.f32.mrb[0].mxu0 }
  0xee   :  { %v131_v18 = vadd.f32 %v430_v17, %v387_v16  ;;  %v125_v19 = vpop.f32.mrb[1].mxu0 }
  0xef   :  { %v126_v20 = vadd.f32 %v387_v16, %v125_v19 }
  0xf0   :  { %v145_v23 = vmax.f32 %v131_v18, 0.0 }
  0xf1   :  { %v144_v21 = vmax.f32 %v126_v20, 0.0  ;;  %v433_v22 = vpop.f32.mrb[2].mxu0 }
  0xf2   :  { %v141_v24 = vadd.f32 %v433_v22, %v387_v16  ;;  %v135_v25 = vpop.f32.mrb[3].mxu0 }
  0xf3   :  { %v136_v26 = vadd.f32 %v387_v16, %v135_v25  ;;  %442 = vmatprep.mubr.msk.f32.mxu1 %vm157_vm1, %v144_v21 }
  0xf4   :  { %443 = vmatmul.mubr.msk.f32.vlgmr.msra.gmra.mrb[0].mxu1 %vm157_vm1, %v145_v23  ;;  %v147_v28 = vmax.f32 %v141_v24, 0.0 }
  0xf5   :  { %v146_v27 = vmax.f32 %v136_v26, 0.0 }
  0xf7   :  { %445 = vmatprep.mubr.msk.f32.mxu1 %vm157_vm1, %v146_v27 }
  0xf8   :  { %446 = vmatmul.mubr.msk.f32.gmra.mrb[2].mxu1 %vm157_vm1, %v147_v28 }
 0x1c7   :  { %v444_v33 = vpop.f32.mrb[0].mxu1 }
 0x1c8   :  { %v242_v34 = vadd.f32 %v444_v33, %v392_v32  ;;  %v236_v35 = vpop.f32.mrb[1].mxu1 }
 0x1c9   :  { %v237_v36 = vadd.f32 %v392_v32, %v236_v35 }
 0x1ca   :  { %v256_v39 = vmax.f32 %v242_v34, 0.0 }
 0x1cb   :  { %v255_v37 = vmax.f32 %v237_v36, 0.0  ;;  %v447_v38 = vpop.f32.mrb[2].mxu1 }
 0x1cc   :  { %v252_v40 = vadd.f32 %v447_v38, %v392_v32  ;;  %v246_v41 = vpop.f32.mrb[3].mxu1 }
 0x1cd   :  { %v247_v42 = vadd.f32 %v392_v32, %v246_v41  ;;  %456 = vmatprep.mubr.msk.f32.mxu0 %vm157_vm1, %v255_v37 }
 0x1ce   :  { %457 = vmatmul.mubr.msk.f32.vlgmr.msra.gmra.mrb[4].mxu0 %vm157_vm1, %v256_v39  ;;  %v258_v44 = vmax.f32 %v252_v40, 0.0 }
 0x1cf   :  { %v257_v43 = vmax.f32 %v247_v42, 0.0 }
 0x1d1   :  { %459 = vmatprep.mubr.msk.f32.mxu0 %vm157_vm1, %v257_v43 }
 0x1d2   :  { %460 = vmatmul.mubr.msk.f32.gmra.mrb[6].mxu0 %vm157_vm1, %v258_v44 }
 0x2a1   :  { %v458_v46 = vpop.f32.mrb[4].mxu0 }
 0x2a2   :  { %v352_v47 = vadd.f32 %v458_v46, %v397_v45  ;;  %v346_v48 = vpop.f32.mrb[5].mxu0 }
 0x2a3   :  { %v347_v49 = vadd.f32 %v397_v45, %v346_v48 }
 0x2a4   :  { %367 = vst.msk [vmem:[#allocation5 + $0x8] sm:$0xff] %vm365_vm2, %v352_v47 }
 0x2a5   :  { %366 = vst.msk [vmem:[#allocation5] sm:$0xff] %vm365_vm2, %v347_v49  ;;  %v461_v50 = vpop.f32.mrb[6].mxu0 }
 0x2a6   :  { %v362_v51 = vadd.f32 %v461_v50, %v397_v45  ;;  %v356_v52 = vpop.f32.mrb[7].mxu0 }
 0x2a7   :  { %v357_v53 = vadd.f32 %v397_v45, %v356_v52 }
 0x2a8   :  { %369 = vst.msk [vmem:[#allocation5 + $0x18] sm:$0xff] %vm365_vm2, %v362_v51 }
 0x2a9   :  { %368 = vst.msk [vmem:[#allocation5 + $0x10] sm:$0xff] %vm365_vm2, %v357_v53 }
 0x2aa   :  { %374 = vsyncadd [#allocation4], 480  ;;  %s539_s8 = smov [#allocation5]  }
 0x2ab   :  { %s375_s9 = sshll.u32 %s539_s8, 4  ;;  %s376_s9 = int_to_ptr.vmem [resolvable:$true] %s375_s9 }
 0x2ac   :  { %s510_s10 = scalar_lea.vmem %s376_s9, 32  ;;  %s514_s4 = scalar_lea.vmem %s376_s9, 512 }
 0x2ad   :  { %p511_p8 = scmp.ne.s32.totalorder %s376_s9, %s510_s10  ;;  %p515_p9 = scmp.lt.s32.totalorder %s376_s9, %s376_s9 }
 0x2ae   :  { %p516_p10 = scmp.lt.s32.totalorder %s514_s4, %s510_s10 }
 0x2b0   :  { %p517_p11 = por %p516_p10, %p515_p9 }
 0x2b2   :  { %p518_p12 = pnand %p517_p11, %p511_p8 }
 0x2b4   :  { %521 = shalt.err (!%p518_p12)
}
 0x2b5   :  { %s522_s1 = scalar_lea.hbm %s658_s5, 32 }
 0x2b6   :  { %p523_p13 = scmp.ne.s32.totalorder %s658_s5, %s522_s1  ;;  %p526_p0 = scmp.lt.u32.totalorder %s522_s1, %s658_s5 }
 0x2b8   :  { %p528_p1 = pnand %p526_p0, %p523_p13 }
 0x2ba   :  { %531 = shalt.err (!%p528_p1)
}
 0x2bb   :  { %s540_s17 = smov 32   ;;  %s541_s18 = smov 2  }
 0x2bc   :  { %381 = dma.vmem_to_hbm [thread:$0]  %s376_s9, 32, %s658_s5, [#allocation4], %s540_s17, %s540_s17, %s541_s18  }
 0x2bd   :  { %534 = dma.done.wait [#allocation4], 512  }
 0x2be   :  { %535 = vsyncadd [#allocation4], 4294966784 }
 0x2bf   :  { %385 = vsyncpa [#allocation3], 1 }
 0x2c0   :  { %386 = vsyncpa [#allocation4], 1 }

</bundles_post_ra>
